<compile_context>
chip_gen: v7x
topology: tpu7x:2x2x1
jax: 0.10.0
libtpu: 0.0.40
codegen_flags: <defaults>
</compile_context>

<pallas_src>
import jax
import jax.numpy as jnp
from jax.experimental import pallas as pl
from jax.experimental.pallas import tpu as pltpu

# ----- module-level constants from the PyTorch code -----
atomic_number_to_index = {1: 0, 6: 1, 7: 2, 8: 3, 9: 4}
NUM_NODE_TYPES = 5
OUT_DIM_DIPOLES = 3
OUT_DIM_QUADRUPOLES = 6
RO_PAD = 128  # lane-padded fused readout width (cols 0:3 dipoles, 3:9 quadrupoles)

# jnp lookup table so z indexing is traceable (no host Python loop needed)
_ATOMIC_LOOKUP = (
    jnp.full((10,), -1, dtype=jnp.int32)
    .at[jnp.array([1, 6, 7, 8, 9], dtype=jnp.int32)]
    .set(jnp.arange(NUM_NODE_TYPES, dtype=jnp.int32))
)


def _round_up(x, m):
    return ((x + m - 1) // m) * m


# ----------------------------- Pallas kernel -----------------------------
def _egnn_kernel(adj_ref, xb_ref, xr_ref, deg_ref,
                 w_sh_ref, b_sh_ref, w_ro_ref, b_ro_ref,
                 out_ref):
    # adj_ref : [TM, N]  bf16 row tile of the adjacency (A[i,j] = #edges j->i)
    # xb_ref  : [N, Fin] bf16 node features (matmul operand, whole array)
    # xr_ref  : [TM, Fin] f32 node features for this row tile (elementwise path)
    # deg_ref : [TM, 1]  f32 in-degree, precomputed in the wrapper
    # w_sh_ref: [Fin, H] f32, b_sh_ref: [1, H] f32
    # w_ro_ref: [H, 128] f32 fused readout weights, b_ro_ref: [1, 128] f32
    # out_ref : [TM, 128] f32 fused, lane-dense output

    # sum over incoming edges of x_j  (bf16 MXU matmul, f32 accumulation)
    neigh = jnp.dot(adj_ref[...], xb_ref[...],
                    preferred_element_type=jnp.float32)          # [TM, Fin] f32

    deg = deg_ref[...]                                           # [TM, 1]
    msg_sum = neigh - deg * xr_ref[...]                          # f32 elementwise

    # Linear applied per-edge then summed  ==  W(sum diff) + deg * b
    h = jnp.dot(msg_sum, w_sh_ref[...],
                preferred_element_type=jnp.float32)              # [TM, H]
    h = h + deg * b_sh_ref[...]
    # update(): ReLU, then forward() applies ReLU again (idempotent)
    h = jnp.maximum(h, 0.0)

    # fused readout heads, single lane-dense store
    out_ref[...] = (jnp.dot(h, w_ro_ref[...],
                            preferred_element_type=jnp.float32)
                    + b_ro_ref[...])                             # [TM, 128]


def _run_egnn_kernel(adj_bf16, x_bf16, x_f32, deg, w_sh_t, b_sh, w_ro, b_ro, tm):
    n_pad, fin = x_f32.shape
    hidden = w_sh_t.shape[1]
    grid = (n_pad // tm,)

    # VMEM budget: double-buffered bf16 adj row tile dominates; add the small
    # whole-array operands, the double-buffered small tiles, and headroom.
    adj_tile_bytes = tm * n_pad * 2
    small_tiles = 2 * (tm * fin * 4 + tm * 4 + tm * RO_PAD * 4)
    resident = (n_pad * fin * 2
                + (fin * hidden + hidden + hidden * RO_PAD + RO_PAD) * 4)
    vmem_bytes = int(max(2 * adj_tile_bytes + small_tiles + resident + (8 << 20),
                         32 << 20))

    return pl.pallas_call(
        _egnn_kernel,
        out_shape=jax.ShapeDtypeStruct((n_pad, RO_PAD), jnp.float32),
        grid_spec=pltpu.PrefetchScalarGridSpec(
            num_scalar_prefetch=0,
            grid=grid,
            in_specs=[
                pl.BlockSpec((tm, n_pad), lambda i: (i, 0)),      # adj row tile (bf16)
                pl.BlockSpec((n_pad, fin), lambda i: (0, 0)),     # x bf16 (whole)
                pl.BlockSpec((tm, fin), lambda i: (i, 0)),        # x f32 row tile
                pl.BlockSpec((tm, 1), lambda i: (i, 0)),          # deg row tile
                pl.BlockSpec((fin, hidden), lambda i: (0, 0)),    # W_sh^T
                pl.BlockSpec((1, hidden), lambda i: (0, 0)),      # b_sh
                pl.BlockSpec((hidden, RO_PAD), lambda i: (0, 0)), # fused readout W
                pl.BlockSpec((1, RO_PAD), lambda i: (0, 0)),      # fused readout b
            ],
            out_specs=pl.BlockSpec((tm, RO_PAD), lambda i: (i, 0)),
        ),
        compiler_params=pltpu.CompilerParams(
            dimension_semantics=("parallel",),   # row tiles shard across v7x's 2 TCs
            vmem_limit_bytes=vmem_bytes,
        ),
    )(adj_bf16, x_bf16, x_f32, deg, w_sh_t, b_sh, w_ro, b_ro)


# ----------------------------- Python wrapper -----------------------------
def init_params(key, num_node_features, hidden_dim):
    """Deterministic parameter init mirroring the module's __init__ shapes."""
    sh_in = num_node_features + 3  # pos(3) concat embedding(num_node_features)
    ks = jax.random.split(key, 7)
    params = {
        # nn.Embedding(NUM_NODE_TYPES, num_node_features)
        "emb": jax.random.normal(ks[0], (NUM_NODE_TYPES, num_node_features), jnp.float32),
        # SphericalHarmonicsLayer.lin : Linear(sh_in, hidden_dim)
        "w_sh": jax.random.normal(ks[1], (hidden_dim, sh_in), jnp.float32) * 0.1,
        "b_sh": jax.random.normal(ks[2], (hidden_dim,), jnp.float32) * 0.1,
        # lin_dipoles : Linear(hidden_dim, 3)
        "w_d": jax.random.normal(ks[3], (OUT_DIM_DIPOLES, hidden_dim), jnp.float32) * 0.1,
        "b_d": jax.random.normal(ks[4], (OUT_DIM_DIPOLES,), jnp.float32) * 0.1,
        # lin_quadrupoles : Linear(hidden_dim, 6)
        "w_q": jax.random.normal(ks[5], (OUT_DIM_QUADRUPOLES, hidden_dim), jnp.float32) * 0.1,
        "b_q": jax.random.normal(ks[6], (OUT_DIM_QUADRUPOLES,), jnp.float32) * 0.1,
    }
    return params


def egnn_forward(params, pos, z, edge_index, num_graphs=1):
    """Forward pass matching EGNN.forward (num_graphs=1, as required by .view)."""
    n = pos.shape[0]

    # --- glue (plain JAX): embedding lookup, concat, dense adjacency build ---
    z_arr = jnp.asarray(z, dtype=jnp.int32)
    z_idx = _ATOMIC_LOOKUP[z_arr]
    emb = params["emb"][z_idx]                                    # [N, num_node_features]
    x = jnp.concatenate([pos, emb], axis=-1).astype(jnp.float32)  # [N, 3 + F]
    fin = x.shape[1]
    hidden = params["w_sh"].shape[0]

    # row-tile sizing: multiple of 8, <= 512, shrink if the double-buffered bf16
    # adjacency tile would exceed ~24 MiB (keeps v7x's 64 MiB VMEM comfortable)
    n8 = _round_up(n, 8)
    tm = 512 if n8 >= 512 else n8
    while tm > 8 and 2 * tm * _round_up(n, tm) * 2 > (24 << 20):
        tm //= 2
    n_pad = _round_up(n, tm)

    src, dst = edge_index[0], edge_index[1]                       # message flows src -> dst
    adj = jnp.zeros((n_pad, n_pad), jnp.float32).at[dst, src].add(1.0)  # A[i, j] = #edges j->i
    deg = jnp.sum(adj, axis=1, keepdims=True)                     # [N_pad, 1] f32 (outside kernel)
    adj_bf16 = adj.astype(jnp.bfloat16)                           # small integer counts: exact

    x_pad = jnp.zeros((n_pad, fin), jnp.float32).at[:n].set(x)
    x_bf16 = x_pad.astype(jnp.bfloat16)                           # matmul operand only

    # fused, zero-padded readout: cols 0:3 = dipoles, 3:9 = quadrupoles, rest 0
    w_ro = jnp.zeros((hidden, RO_PAD), jnp.float32)
    w_ro = w_ro.at[:, :OUT_DIM_DIPOLES].set(params["w_d"].T)
    w_ro = w_ro.at[:, OUT_DIM_DIPOLES:OUT_DIM_DIPOLES + OUT_DIM_QUADRUPOLES].set(params["w_q"].T)
    b_ro = jnp.zeros((1, RO_PAD), jnp.float32)
    b_ro = b_ro.at[0, :OUT_DIM_DIPOLES].set(params["b_d"])
    b_ro = b_ro.at[0, OUT_DIM_DIPOLES:OUT_DIM_DIPOLES + OUT_DIM_QUADRUPOLES].set(params["b_q"])

    # --- hot path in Pallas ---
    out = _run_egnn_kernel(
        adj_bf16, x_bf16, x_pad, deg,
        params["w_sh"].T, params["b_sh"][None, :],
        w_ro, b_ro, tm,
    )

    dip = out[:n, :OUT_DIM_DIPOLES]
    quad = out[:n, OUT_DIM_DIPOLES:OUT_DIM_DIPOLES + OUT_DIM_QUADRUPOLES]
    dipole_pred = dip.reshape(-1, n, OUT_DIM_DIPOLES)
    quadrupole_pred = quad.reshape(-1, n, OUT_DIM_QUADRUPOLES)
    return dipole_pred, quadrupole_pred


def egnn_reference(params, pos, z, edge_index, num_graphs=1):
    """Pure-JAX edge-wise f32 reference (scatter-add message passing) for validation."""
    n = pos.shape[0]
    z_arr = jnp.asarray(z, dtype=jnp.int32)
    z_idx = _ATOMIC_LOOKUP[z_arr]
    x = jnp.concatenate([pos, params["emb"][z_idx]], axis=-1).astype(jnp.float32)
    src, dst = edge_index[0], edge_index[1]
    msg = (x[src] - x[dst]) @ params["w_sh"].T + params["b_sh"]   # per-edge Linear
    aggr = jnp.zeros((n, params["w_sh"].shape[0]), jnp.float32).at[dst].add(msg)
    h = jax.nn.relu(aggr)
    h = jax.nn.relu(h)
    dip = (h @ params["w_d"].T + params["b_d"]).reshape(-1, n, OUT_DIM_DIPOLES)
    quad = (h @ params["w_q"].T + params["b_q"]).reshape(-1, n, OUT_DIM_QUADRUPOLES)
    return dip, quad


if __name__ == "__main__":
    key = jax.random.PRNGKey(0)
    k_pos, k_param = jax.random.split(key)

    # Small synthetic molecule graph: 8 nodes, 1 graph.
    num_nodes = 8
    num_node_features = 5
    hidden_dim = 32
    num_degrees = 3  # unused by the forward pass (kept for signature parity)

    pos = jax.random.normal(k_pos, (num_nodes, 3), jnp.float32)
    z = [1, 6, 7, 8, 9, 6, 1, 8]  # atomic numbers
    # directed edges (src -> dst): a ring + a few extra edges
    src = jnp.array([0, 1, 2, 3, 4, 5, 6, 7, 0, 2, 4, 6, 1, 5, 3, 7], dtype=jnp.int32)
    dst = jnp.array([1, 2, 3, 4, 5, 6, 7, 0, 4, 6, 0, 2, 5, 1, 7, 3], dtype=jnp.int32)
    edge_index = jnp.stack([src, dst], axis=0)

    params = init_params(k_param, num_node_features, hidden_dim)

    dip, quad = egnn_forward(params, pos, z, edge_index, num_graphs=1)
    jax.block_until_ready((dip, quad))

    dip_ref, quad_ref = egnn_reference(params, pos, z, edge_index, num_graphs=1)
    assert dip.shape == (1, num_nodes, OUT_DIM_DIPOLES)
    assert quad.shape == (1, num_nodes, OUT_DIM_QUADRUPOLES)
    # bf16 matmul operands (adj exact; x loses ~3 decimal digits) -> loosened tolerance
    assert jnp.allclose(dip, dip_ref, atol=5e-2, rtol=5e-2)
    assert jnp.allclose(quad, quad_ref, atol=5e-2, rtol=5e-2)

    print("KERNEL_OK")
</pallas_src>

<mosaic_0001>
module attributes {stable_mosaic.version = 11 : i64} {
  func.func @_egnn_kernel(%arg0: i32, %arg1: memref<8x8xbf16, #tpu.memory_space<vmem>>, %arg2: memref<8x8xbf16, #tpu.memory_space<vmem>>, %arg3: memref<8x8xf32, #tpu.memory_space<vmem>>, %arg4: memref<8x1xf32, #tpu.memory_space<vmem>>, %arg5: memref<8x32xf32, #tpu.memory_space<vmem>>, %arg6: memref<1x32xf32, #tpu.memory_space<vmem>>, %arg7: memref<32x128xf32, #tpu.memory_space<vmem>>, %arg8: memref<1x128xf32, #tpu.memory_space<vmem>>, %arg9: memref<8x128xf32, #tpu.memory_space<vmem>>) attributes {dimension_semantics = [#tpu.dimension_semantics<parallel>], iteration_bounds = array<i64: 1>, scalar_prefetch = 0 : i64, scratch_operands = 0 : i64, tpu.core_type = #tpu.core_type<tc>, window_params = [{transform_indices = @transform_0, window_bounds = array<i64: 8, 8>}, {pipeline_mode = #tpu.pipeline_mode<synchronous>, transform_indices = @transform_1, window_bounds = array<i64: 8, 8>}, {transform_indices = @transform_2, window_bounds = array<i64: 8, 8>}, {transform_indices = @transform_3, window_bounds = array<i64: 8, 1>}, {pipeline_mode = #tpu.pipeline_mode<synchronous>, transform_indices = @transform_4, window_bounds = array<i64: 8, 32>}, {pipeline_mode = #tpu.pipeline_mode<synchronous>, transform_indices = @transform_5, window_bounds = array<i64: 1, 32>}, {pipeline_mode = #tpu.pipeline_mode<synchronous>, transform_indices = @transform_6, window_bounds = array<i64: 32, 128>}, {pipeline_mode = #tpu.pipeline_mode<synchronous>, transform_indices = @transform_7, window_bounds = array<i64: 1, 128>}, {transform_indices = @transform_8, window_bounds = array<i64: 8, 128>}]} {
    %c0 = arith.constant 0 : index
    %c0_0 = arith.constant 0 : index
    %0 = vector.load %arg1[%c0, %c0_0] : memref<8x8xbf16, #tpu.memory_space<vmem>>, vector<8x8xbf16>
    %c0_1 = arith.constant 0 : index
    %c0_2 = arith.constant 0 : index
    %1 = vector.load %arg2[%c0_1, %c0_2] : memref<8x8xbf16, #tpu.memory_space<vmem>>, vector<8x8xbf16>
    %cst = arith.constant dense<0.000000e+00> : vector<8x8xf32>
    %2 = tpu.matmul %0, %1, %cst {dimension_numbers = #tpu.dot_dimension_numbers<[1], [0], [0], [1], [0, 0, 1, 1], [], []>} : vector<8x8xbf16>, vector<8x8xbf16>, vector<8x8xf32> -> vector<8x8xf32>
    %c0_3 = arith.constant 0 : index
    %c0_4 = arith.constant 0 : index
    %3 = vector.load %arg4[%c0_3, %c0_4] : memref<8x1xf32, #tpu.memory_space<vmem>>, vector<8x1xf32>
    %c0_5 = arith.constant 0 : index
    %c0_6 = arith.constant 0 : index
    %4 = vector.load %arg3[%c0_5, %c0_6] : memref<8x8xf32, #tpu.memory_space<vmem>>, vector<8x8xf32>
    %5 = vector.broadcast %3 : vector<8x1xf32> to vector<8x8xf32>
    %6 = arith.mulf %5, %4 : vector<8x8xf32>
    %7 = arith.subf %2, %6 : vector<8x8xf32>
    %c0_7 = arith.constant 0 : index
    %c0_8 = arith.constant 0 : index
    %8 = vector.load %arg5[%c0_7, %c0_8] : memref<8x32xf32, #tpu.memory_space<vmem>>, vector<8x32xf32>
    %cst_9 = arith.constant dense<0.000000e+00> : vector<8x32xf32>
    %9 = tpu.matmul %7, %8, %cst_9 {dimension_numbers = #tpu.dot_dimension_numbers<[1], [0], [0], [1], [0, 0, 1, 1], [], []>} : vector<8x8xf32>, vector<8x32xf32>, vector<8x32xf32> -> vector<8x32xf32>
    %c0_10 = arith.constant 0 : index
    %c0_11 = arith.constant 0 : index
    %10 = vector.load %arg6[%c0_10, %c0_11] : memref<1x32xf32, #tpu.memory_space<vmem>>, vector<1x32xf32>
    %11 = vector.broadcast %3 : vector<8x1xf32> to vector<8x32xf32>
    %12 = vector.broadcast %10 : vector<1x32xf32> to vector<8x32xf32>
    %13 = arith.mulf %11, %12 : vector<8x32xf32>
    %14 = arith.addf %9, %13 : vector<8x32xf32>
    %cst_12 = arith.constant 0.000000e+00 : f32
    %15 = vector.broadcast %cst_12 : f32 to vector<8x32xf32>
    %16 = arith.maximumf %14, %15 : vector<8x32xf32>
    %c0_13 = arith.constant 0 : index
    %c0_14 = arith.constant 0 : index
    %17 = vector.load %arg7[%c0_13, %c0_14] : memref<32x128xf32, #tpu.memory_space<vmem>>, vector<32x128xf32>
    %cst_15 = arith.constant dense<0.000000e+00> : vector<8x128xf32>
    %18 = tpu.matmul %16, %17, %cst_15 {dimension_numbers = #tpu.dot_dimension_numbers<[1], [0], [0], [1], [0, 0, 1, 1], [], []>} : vector<8x32xf32>, vector<32x128xf32>, vector<8x128xf32> -> vector<8x128xf32>
    %c0_16 = arith.constant 0 : index
    %c0_17 = arith.constant 0 : index
    %19 = vector.load %arg8[%c0_16, %c0_17] : memref<1x128xf32, #tpu.memory_space<vmem>>, vector<1x128xf32>
    %20 = vector.broadcast %19 : vector<1x128xf32> to vector<8x128xf32>
    %21 = arith.addf %18, %20 : vector<8x128xf32>
    %c0_18 = arith.constant 0 : index
    %c0_19 = arith.constant 0 : index
    %22 = vector.load %arg9[%c0_18, %c0_19] : memref<8x128xf32, #tpu.memory_space<vmem>>, vector<8x128xf32>
    tpu.vector_store %arg9[%c0_18, %c0_19], %21 {strides = array<i32>} : memref<8x128xf32, #tpu.memory_space<vmem>>, vector<8x128xf32>,
    return
  }
  func.func @transform_0(%arg0: i32) -> (i32, i32) {
    %c0_i32 = arith.constant 0 : i32
    %c0_i32_0 = arith.constant 0 : i32
    return %arg0, %c0_i32 : i32, i32
  }
  func.func @transform_1(%arg0: i32) -> (i32, i32) {
    %c0_i32 = arith.constant 0 : i32
    %c0_i32_0 = arith.constant 0 : i32
    %c0_i32_1 = arith.constant 0 : i32
    return %c0_i32, %c0_i32_0 : i32, i32
  }
  func.func @transform_2(%arg0: i32) -> (i32, i32) {
    %c0_i32 = arith.constant 0 : i32
    %c0_i32_0 = arith.constant 0 : i32
    return %arg0, %c0_i32 : i32, i32
  }
  func.func @transform_3(%arg0: i32) -> (i32, i32) {
    %c0_i32 = arith.constant 0 : i32
    %c0_i32_0 = arith.constant 0 : i32
    return %arg0, %c0_i32 : i32, i32
  }
  func.func @transform_4(%arg0: i32) -> (i32, i32) {
    %c0_i32 = arith.constant 0 : i32
    %c0_i32_0 = arith.constant 0 : i32
    %c0_i32_1 = arith.constant 0 : i32
    return %c0_i32, %c0_i32_0 : i32, i32
  }
  func.func @transform_5(%arg0: i32) -> (i32, i32) {
    %c0_i32 = arith.constant 0 : i32
    %c0_i32_0 = arith.constant 0 : i32
    %c0_i32_1 = arith.constant 0 : i32
    return %c0_i32, %c0_i32_0 : i32, i32
  }
  func.func @transform_6(%arg0: i32) -> (i32, i32) {
    %c0_i32 = arith.constant 0 : i32
    %c0_i32_0 = arith.constant 0 : i32
    %c0_i32_1 = arith.constant 0 : i32
    return %c0_i32, %c0_i32_0 : i32, i32
  }
  func.func @transform_7(%arg0: i32) -> (i32, i32) {
    %c0_i32 = arith.constant 0 : i32
    %c0_i32_0 = arith.constant 0 : i32
    %c0_i32_1 = arith.constant 0 : i32
    return %c0_i32, %c0_i32_0 : i32, i32
  }
  func.func @transform_8(%arg0: i32) -> (i32, i32) {
    %c0_i32 = arith.constant 0 : i32
    %c0_i32_0 = arith.constant 0 : i32
    return %arg0, %c0_i32 : i32, i32
  }
}

</mosaic_0001>

<bundles_post_ra>
// kernel: tpu_custom_call.1
= control target key start
LH: loop header
LB: loop body
LE: loop exit
PB: predicated region body
PF: predicated region fallthrough
CT: control target
= control target key end

     0   :  { %13 = vsyncpa [#allocation3], 0  ;;  %s582_s0 = inlined_call_operand.hbm [shape: bf16[8,8], index: 0, kind: input, shape index: {}]   ;;  %s583_s1 = inlined_call_operand.hbm [shape: bf16[8,8], index: 1, kind: input, shape index: {}]   ;;  %s584_s2 = inlined_call_operand.vmem [shape: f32[8,8], index: 2, kind: input, shape index: {}]   ;;  %s585_s3 = inlined_call_operand.vmem [shape: f32[8,1], index: 3, kind: input, shape index: {}]   ;;  %s586_s4 = inlined_call_operand.vmem [shape: f32[8,32], index: 4, kind: input, shape index: {}]   ;;  %s587_s5 = inlined_call_operand.vmem [shape: f32[1,32], index: 5, kind: input, shape index: {}]   ;;  %s588_s6 = inlined_call_operand.hbm [shape: f32[32,128], index: 6, kind: input, shape index: {}]   ;;  %s589_s7 = inlined_call_operand.vmem [shape: f32[1,128], index: 7, kind: input, shape index: {}]   ;;  %s590_s8 = inlined_call_operand.hbm [shape: f32[8,128], index: 8, kind: output, shape index: {}]  }
   0x1   :  { %14 = vsyncpa [#allocation6], 0 }
   0x2   :  { %15 = vsyncpa [#allocation4], 0  ;;  %s459_s27 = smov [#allocation5]   ;;  %s460_s29 = smov [#allocation2]  }
   0x3   :  { %s32_s28 = sshll.u32 %s459_s27, 4  ;;  %s22_s30 = sshll.u32 %s460_s29, 4  ;;  %s33_s28 = int_to_ptr.vmem [resolvable:$true] %s32_s28  ;;  %s23_s30 = int_to_ptr.vmem [resolvable:$true] %s22_s30 }
   0x4   :  { %s365_s11 = scalar_lea.hbm %s583_s1, 64 }
   0x5   :  { %p366_p0 = scmp.ne.s32.totalorder %s583_s1, %s365_s11  ;;  %p369_p1 = scmp.lt.u32.totalorder %s365_s11, %s583_s1 }
   0x7   :  { %p371_p2 = pnand %p369_p1, %p366_p0 }
   0x9   :  { %374 = shalt.err (!%p371_p2)
}
   0xa   :  { %s375_s16 = scalar_lea.vmem %s33_s28, 64  ;;  %p380_p4 = scmp.lt.s32.totalorder %s33_s28, %s33_s28 }
   0xb   :  { %p376_p3 = scmp.ne.s32.totalorder %s33_s28, %s375_s16  ;;  %p381_p5 = scmp.lt.s32.totalorder %s375_s16, %s375_s16 }
   0xd   :  { %p382_p6 = por %p381_p5, %p380_p4 }
   0xf   :  { %p383_p7 = pnand %p382_p6, %p376_p3 }
  0x11   :  { %386 = shalt.err (!%p383_p7)
}
  0x12   :  { %35 = dma.hbm_to_vmem [thread:$0]  %s583_s1, 64, %s33_s28, [#allocation6]  }
  0x13   :  { %s387_s21 = scalar_lea.hbm %s582_s0, 64 }
  0x14   :  { %p388_p8 = scmp.ne.s32.totalorder %s582_s0, %s387_s21  ;;  %p391_p9 = scmp.lt.u32.totalorder %s387_s21, %s582_s0 }
  0x16   :  { %p393_p10 = pnand %p391_p9, %p388_p8 }
  0x18   :  { %396 = shalt.err (!%p393_p10)
}
  0x19   :  { %s397_s26 = scalar_lea.vmem %s23_s30, 64  ;;  %p402_p12 = scmp.lt.s32.totalorder %s23_s30, %s23_s30 }
  0x1a   :  { %p398_p11 = scmp.ne.s32.totalorder %s23_s30, %s397_s26  ;;  %p403_p13 = scmp.lt.s32.totalorder %s397_s26, %s397_s26 }
  0x1c   :  { %p404_p0 = por %p403_p13, %p402_p12 }
  0x1e   :  { %p405_p1 = pnand %p404_p0, %p398_p11 }
  0x20   :  { %408 = shalt.err (!%p405_p1)
}
  0x21   :  { %25 = dma.hbm_to_vmem [thread:$0]  %s582_s0, 64, %s23_s30, [#allocation3]  }
  0x22   :  { %s461_s28 = smov [#allocation7]   ;;  %s409_s11 = scalar_lea.hbm %s588_s6, 512 }
  0x23   :  { %s49_s29 = sshll.u32 %s461_s28, 4  ;;  %p410_p2 = scmp.ne.s32.totalorder %s588_s6, %s409_s11  ;;  %s50_s29 = int_to_ptr.vmem [resolvable:$true] %s49_s29 }
  0x24   :  { %p413_p3 = scmp.lt.u32.totalorder %s409_s11, %s588_s6 }
  0x26   :  { %p415_p4 = pnand %p413_p3, %p410_p2 }
  0x28   :  { %418 = shalt.err (!%p415_p4)
}
  0x29   :  { %s419_s16 = scalar_lea.vmem %s50_s29, 512  ;;  %p424_p6 = scmp.lt.s32.totalorder %s50_s29, %s50_s29 }
  0x2a   :  { %p420_p5 = scmp.ne.s32.totalorder %s50_s29, %s419_s16  ;;  %p425_p7 = scmp.lt.s32.totalorder %s419_s16, %s419_s16 }
  0x2c   :  { %p426_p8 = por %p425_p7, %p424_p6 }
  0x2e   :  { %p427_p9 = pnand %p426_p8, %p420_p5 }
  0x30   :  { %430 = shalt.err (!%p427_p9)
}
  0x31   :  { %s462_s0 = smov 128   ;;  %s463_s30 = smov 8  }
  0x32   :  { %55 = dma.hbm_to_vmem [thread:$0]  %s588_s6, 512, %s50_s29, [#allocation6], %s462_s0, %s462_s0, %s463_s30  }
  0x33   :  { %453 = dma.done.wait [#allocation3], 64  }
  0x34   :  { %454 = vsyncadd [#allocation3], 4294967232 }
  0x35   :  { %455 = dma.done.wait [#allocation6], 576  }
  0x36   :  { %456 = vsyncadd [#allocation6], 4294966720  ;;  %v464_v0 = vmov 0.0   ;;  %vm465_vm0 = vmmov 0   ;;  %v466_v1 = vmov 0   ;;  %vm74_vm1 = vcmask 1043456  }
  0x37   :  { %326 = vmatprep.subr.bf16.mxu0 %v464_v0  ;;  %328 = vmatprep.mubr.msk.bf16.mxu0 %vm465_vm0, %v464_v0  ;;  %v69_v2 = vld [vmem:[#allocation5] sm:$0xf]  ;;  %v68_v5 = vld [vmem:[#allocation2] sm:$0xf]  ;;  %vm70_vm2 = vcmask 64512   ;;  %v467_v7 = vmov 0.0|0.0  }
  0x38   :  { %364 = vset.pattern.permute.xlu0 %v466_v1  ;;  %332 = vmatprep.subr.mxu1 %v464_v0  ;;  %v118_v3 = vld [vmem:[%s585_s3] sm:$0xff]  ;;  %v76_v4 = vsel %vm74_vm1, %v69_v2, 0  ;;  %v210_v11 = vld [vmem:[#allocation7] sm:$0xff]  ;;  %v211_v12 = vld [vmem:[#allocation7 + $0x8] sm:$0xff]  ;;  %vm221_vm3 = vcmask 261120   ;;  %s468_s25 = smov [#allocation8]  }
  0x39   :  { %334 = vmatprep.mubr.msk.f32.mxu1 %vm465_vm0, %v464_v0  ;;  %122 = vperm.xlu0 %364, %v118_v3   ;;  %v127_v6 = vld [vmem:[%s586_s4] sm:$0xff]  ;;  %v349_v14 = vpack.c.bf16 %v211_v12, %v210_v11  ;;  %v212_v19 = vld [vmem:[#allocation7 + $0x10] sm:$0xff]  ;;  %s302_s26 = sshll.u32 %s468_s25, 4  ;;  %s303_s26 = int_to_ptr.vmem [resolvable:$true] %s302_s26 }
  0x3a   :  { %327 = vmatpush3.bf16.msra.mxu0 %v76_v4  ;;  %333 = vmatpush3.msra.mxu1 %v127_v6  ;;  %v119_v8 = vld [vmem:[%s584_s2] sm:$0xff]  ;;  %s431_s1 = scalar_lea.vmem %s303_s26, 128  ;;  %p436_p11 = scmp.lt.s32.totalorder %s303_s26, %s303_s26 }
  0x3b   :  { %348 = vmatprep.subr.bf16.mxu1 %v467_v7  ;;  %v213_v20 = vld [vmem:[#allocation7 + $0x18] sm:$0xff]  ;;  %p432_p10 = scmp.ne.s32.totalorder %s303_s26, %s431_s1  ;;  %p437_p12 = scmp.lt.s32.totalorder %s431_s1, %s431_s1 }
  0x3c   :  { %v352_v21 = vpack.c.bf16 %v213_v20, %v212_v19  ;;  %v313_v22 = vld [vmem:[%s587_s5] ss:$0 sm:$0xff] }
  0x3d   :  { %329 = vmatmul.mubr.msk.bf16.vlgmr.msra.gmra.mrb[0].mxu0 %vm70_vm2, %v68_v5  ;;  %v315_v28 = vld [vmem:[%s589_s7] ss:$0 sm:$0xff]  ;;  %p438_p13 = por %p437_p12, %p436_p11 }
  0x3f   :  { %p439_p0 = pnand %p438_p13, %p432_p10 }
  0xb8   :  { %v123_v9 = vpop.permute.xlu0 %122 }
  0xb9   :  { %v125_v10 = vmul.f32 %v123_v9, %v119_v8  ;;  %v135_v23 = vmul.f32 %v313_v22, %v123_v9 }
 0x110   :  { %v112_v13 = vpop.f32.mrb[0].mxu0 }
 0x111   :  { %v126_v15 = vsub.f32 %v112_v13, %v125_v10  ;;  %v330_v16 = vpop.f32.mrb[1].mxu0 }
 0x112   :  { %v115_v17 = vpop.f32.mrb[2].mxu0 }
 0x113   :  { %v331_v18 = vpop.f32.mrb[3].mxu0  ;;  %335 = vmatmul.mubr.msk.f32.vlgmr.msra.gmra.mrb[0].mxu1 %vm70_vm2, %v126_v15 }
 0x114   :  { %350 = vmatpush3.bf16.msra.mxu1 %v349_v14  ;;  %345 = vmatprep.mubr.msk.f32.mxu1 %vm465_vm0, %v464_v0 }
 0x115   :  { %351 = vmatprep.subr.bf16.mxu1 %v467_v7 }
 0x118   :  { %353 = vmatpush3.bf16.msra.mxu1 %v352_v21 }
 0x1e6   :  { %v205_v24 = vpop.f32.mrb[0].mxu1 }
 0x1e7   :  { %v206_v25 = vadd.f32 %v205_v24, %v135_v23  ;;  %v336_v26 = vpop.f32.mrb[1].mxu1 }
 0x1e9   :  { %v209_v27 = vmax.f32 %v206_v25, 0.0 }
 0x1eb   :  { %346 = vmatmul.mubr.msk.f32.vlgmr.msra.gmra.mrb[2].mxu1 %vm221_vm3, %v209_v27 }
 0x2be   :  { %v291_v29 = vpop.f32.mrb[2].mxu1 }
 0x2bf   :  { %v292_v30 = vadd.f32 %v315_v28, %v291_v29  ;;  %v347_v31 = vpop.f32.mrb[3].mxu1 }
 0x2c1   :  { %295 = vst [vmem:[#allocation8] sm:$0xff] %v292_v30 }
 0x2c2   :  { %442 = shalt.err (!%p439_p0)
}
 0x2c3   :  { %s443_s28 = scalar_lea.hbm %s590_s8, 128 }
 0x2c4   :  { %p444_p1 = scmp.ne.s32.totalorder %s590_s8, %s443_s28  ;;  %p447_p2 = scmp.lt.u32.totalorder %s443_s28, %s590_s8 }
 0x2c6   :  { %p449_p3 = pnand %p447_p2, %p444_p1 }
 0x2c8   :  { %452 = shalt.err (!%p449_p3)
}
 0x2c9   :  { %305 = dma.vmem_to_hbm [thread:$0]  %s303_s26, 128, %s590_s8, [#allocation4]  }
 0x2ca   :  { %457 = dma.done.wait [#allocation4], 128  }
 0x2cb   :  { %458 = vsyncadd [#allocation4], 4294967168 }
 0x2cc   :  { %309 = vsyncpa [#allocation3], 1 }
 0x2cd   :  { %310 = vsyncpa [#allocation6], 1 }
 0x2ce   :  { %311 = vsyncpa [#allocation4], 1 }

</bundles_post_ra>
